<compile_context>
chip_gen: v5e
topology: v5e:2x2
jax: 0.10.0
libtpu: 0.0.40
codegen_flags: <defaults>
</compile_context>

<pallas_src>
from functools import partial

import jax
import jax.numpy as jnp
from jax import lax
from jax.experimental import pallas as pl
from jax.experimental.pallas import tpu as pltpu


def _cdiv(a, b):
    return -(-a // b)


def _round_up(x, m):
    return _cdiv(x, m) * m


def _vmem_capacity_bytes():
    """Per-core VMEM capacity; falls back to the smallest production value (v7x, 64 MiB)."""
    try:
        return int(pltpu.get_tpu_info().vmem_capacity_bytes)
    except Exception:
        return 64 * 1024 * 1024


def _conv_down_kernel(x_ref, xh_ref, w_ref, b_ref, o_ref, *, d_taps, tile_l):
    """One (batch, L_out-tile) grid step.

    x_ref : (S*Cin, TL)       phase-split input columns (lane axis = output position)
    xh_ref: (S*Cin, HALO)     first HALO phase-split columns of the *next* tile
    w_ref : (D, Cout, S*Cin)  folded weights, one (Cout, S*Cin) slab per tap group d
    b_ref : (Cout, 1)         bias, f32
    o_ref : (Cout, TL)        output tile (already NCL-oriented, lane-dense)
    """
    x_main = x_ref[...]
    # Tap group d = 0 (no shift): plain MXU matmul with f32 accumulation.
    acc = jnp.dot(w_ref[0], x_main, preferred_element_type=jnp.float32)
    if d_taps > 1:
        # Output column t also needs phase-split columns t+1 .. t+D-1; the last few live in
        # the next tile, so stitch the halo on once and take static lane-shifted slices.
        # The D dots run back-to-back and accumulate in f32 (v7x MRB-friendly).
        x_ext = jnp.concatenate([x_main, xh_ref[...]], axis=-1)  # (S*Cin, TL + HALO)
        for d in range(1, d_taps):
            acc = acc + jnp.dot(w_ref[d], x_ext[:, d:d + tile_l],
                                preferred_element_type=jnp.float32)
    # Minimal epilogue: one f32 bias add, one cast, one store.
    o_ref[...] = (acc + b_ref[...]).astype(o_ref.dtype)


def conv_downsample(x, weight, bias, kernel_size, downsample_divide, *,
                    compute_dtype=jnp.bfloat16):
    """ConvDownsample forward.

    x: (N, Cin, L) NCL (PyTorch layout).  weight: (Cout, Cin, K).  bias: (Cout,).
    compute_dtype: dtype fed to the MXU (accumulation is always f32; output keeps x.dtype).
    bf16 halves HBM read bytes on this memory-bound op; pass jnp.float32 for exact f32 math.
    """
    N, Cin, L = x.shape
    Cout = weight.shape[0]
    K = int(kernel_size)
    S = int(downsample_divide)

    pad = max(K - 2 + (S - 2), 0)
    conv_len = (L + pad - K) // S + 1
    l_out = min(L // S, conv_len)            # matches PyTorch's [..., : L // S] truncation
    if l_out <= 0:
        return jnp.zeros((N, Cout, 0), dtype=x.dtype)

    D = _cdiv(K, S)                          # tap groups = lane-shifted matmuls per tile
    scin = S * Cin
    halo = _round_up(max(D - 1, 1), 128)     # cross-tile halo, rounded to full lane tiles

    in_b = jnp.dtype(compute_dtype).itemsize
    out_b = jnp.dtype(x.dtype).itemsize

    # ---- VMEM-aware lane-tile selection (per TPU generation) --------------------------
    vmem_cap = _vmem_capacity_bytes()
    budget = int(vmem_cap * 0.4)             # ~25 MiB on v7x, ~51 MiB on v5e/v6e
    fixed = (2 * scin * halo * in_b          # halo block, double-buffered
             + 2 * D * Cout * scin * in_b    # folded weights (constant index map, 2 bufs)
             + 2 * Cout * 128 * 4)           # bias (lane-padded, f32)
    per_lane = (2 * scin * in_b              # main x block, double-buffered
                + 2 * Cout * out_b           # output block, double-buffered
                + 2 * scin * in_b            # in-kernel concat + shifted-slice temporaries
                + Cout * 4)                  # f32 accumulator
    tl = ((max(budget - fixed, per_lane) // per_lane) // 128) * 128
    tl = max(tl, 128)
    tl = min(tl, _round_up(l_out, 128))      # never tile wider than the output needs
    tl = _round_up(max(tl, halo), halo)      # the halo index map needs halo | tl
    T = _cdiv(l_out, tl)
    if N * T < 2 and l_out > 128:
        # Split the lane axis so both v7x TensorCores get work on the parallel grid.
        tl = _round_up(_cdiv(l_out, 2), halo)
        T = _cdiv(l_out, tl)

    # ---- wrapper glue: ONE pad + ONE phase-split transpose (1x data movement) ---------
    # x_ps[n, s*Cin + c, j] = x_padded[n, c, j*S + s]: the stride is removed up front, so
    # the kernel needs no strided gathers and no HBM-materialized im2col copy.
    Lps = T * tl + halo                      # phase-split length incl. halo (all input
    Lp = Lps * S                             # blocks stay fully in bounds)
    if Lp >= L:
        x_pad = jnp.pad(x, ((0, 0), (0, 0), (0, Lp - L)))
    else:                                    # defensive; valid outputs never read past Lp
        x_pad = x[:, :, :Lp]
    x_ps = (x_pad.reshape(N, Cin, Lps, S)
            .transpose(0, 3, 1, 2)
            .reshape(N, scin, Lps)
            .astype(compute_dtype))

    # w3[d, o, s*Cin + c] = W[o, c, d*S + s]   (taps k >= K are zero-padded)
    Kp = D * S
    w_pad = jnp.pad(weight, ((0, 0), (0, 0), (0, Kp - K)))
    w3 = (w_pad.reshape(Cout, Cin, D, S)
          .transpose(2, 0, 3, 1)
          .reshape(D, Cout, scin)
          .astype(compute_dtype))
    b2 = bias.reshape(Cout, 1).astype(jnp.float32)

    est_vmem = fixed + per_lane * tl
    vmem_limit = int(min(vmem_cap, max(2 * est_vmem, 32 * 1024 * 1024)))

    kernel = partial(_conv_down_kernel, d_taps=D, tile_l=tl)
    halo_blocks_per_tile = tl // halo        # python int, captured by the halo index map

    out = pl.pallas_call(
        kernel,
        # Exact output length: the ragged last lane block is masked on writeback, so there
        # is no trailing [:, :, :l_out] HBM copy and padded lanes are never exposed.
        out_shape=jax.ShapeDtypeStruct((N, Cout, l_out), x.dtype),
        grid=(N, T),
        in_specs=[
            # main phase-split block for this output tile
            pl.BlockSpec((None, scin, tl), lambda n, t: (n, 0, t)),
            # halo: first `halo` columns of the NEXT tile (same array, second view)
            pl.BlockSpec((None, scin, halo),
                         lambda n, t: (n, 0, (t + 1) * halo_blocks_per_tile)),
            # folded weights / bias: constant index maps -> fetched once by the pipeline
            pl.BlockSpec((D, Cout, scin), lambda n, t: (0, 0, 0)),
            pl.BlockSpec((Cout, 1), lambda n, t: (0, 0)),
        ],
        out_specs=pl.BlockSpec((None, Cout, tl), lambda n, t: (n, 0, t)),
        compiler_params=pltpu.CompilerParams(
            dimension_semantics=("parallel", "parallel"),
            vmem_limit_bytes=vmem_limit),
    )(x_ps, x_ps, w3, b2)

    return out


def _reference(x, weight, bias, kernel_size, downsample_divide):
    """Pure-JAX reference mirroring the PyTorch forward."""
    N, Cin, L = x.shape
    pad = max(kernel_size - 2 + (downsample_divide - 2), 0)
    xp = jnp.pad(x, ((0, 0), (0, 0), (0, pad)))
    y = lax.conv_general_dilated(
        xp, weight, window_strides=(downsample_divide,), padding="VALID",
        dimension_numbers=("NCW", "OIW", "NCW"))
    y = y + bias[None, :, None]
    return y[..., : L // downsample_divide]


if __name__ == "__main__":
    # Module config (small, consistent with ConvDownsample.__init__)
    kernel_size = 4
    downsample_divide = 2
    in_dim = 4
    out_dim = 8
    batch = 2
    seq = 16

    key = jax.random.PRNGKey(0)
    kx, kw, kb = jax.random.split(key, 3)

    x = jax.random.normal(kx, (batch, in_dim, seq), dtype=jnp.float32)

    # Deterministic PyTorch-style Conv1d init: U(-bound, bound), bound = 1/sqrt(Cin*K)
    fan_in = in_dim * kernel_size
    bound = 1.0 / (fan_in ** 0.5)
    weight = jax.random.uniform(kw, (out_dim, in_dim, kernel_size),
                                minval=-bound, maxval=bound, dtype=jnp.float32)
    bias = jax.random.uniform(kb, (out_dim,), minval=-bound, maxval=bound,
                              dtype=jnp.float32)

    ref = _reference(x, weight, bias, kernel_size, downsample_divide)

    # 1) exact f32 path (bit-level semantics of the original module)
    out_f32 = jax.block_until_ready(
        conv_downsample(x, weight, bias, kernel_size, downsample_divide,
                        compute_dtype=jnp.float32))
    assert out_f32.shape == ref.shape, (out_f32.shape, ref.shape)
    assert jnp.allclose(out_f32, ref, atol=1e-5, rtol=1e-5), "f32 mismatch vs reference conv"

    # 2) default bf16-fed MXU path (f32 accumulation); compare against the reference conv
    #    run on the same bf16-rounded inputs.
    out_bf16 = jax.block_until_ready(
        conv_downsample(x, weight, bias, kernel_size, downsample_divide))
    ref_bf16 = _reference(x.astype(jnp.bfloat16).astype(jnp.float32),
                          weight.astype(jnp.bfloat16).astype(jnp.float32),
                          bias, kernel_size, downsample_divide)
    assert out_bf16.shape == ref.shape, (out_bf16.shape, ref.shape)
    assert jnp.allclose(out_bf16, ref_bf16, atol=1e-3, rtol=1e-3), "bf16 mismatch vs reference conv"

    print("KERNEL_OK")
</pallas_src>

<mosaic_0001>
module attributes {stable_mosaic.version = 11 : i64} {
  func.func @_conv_down_kernel(%arg0: i32, %arg1: i32, %arg2: memref<1x8x128xf32, #tpu.memory_space<vmem>>, %arg3: memref<1x8x128xf32, #tpu.memory_space<vmem>>, %arg4: memref<2x8x8xf32, #tpu.memory_space<vmem>>, %arg5: memref<8x1xf32, #tpu.memory_space<vmem>>, %arg6: memref<1x8x128xf32, #tpu.memory_space<vmem>>) attributes {dimension_semantics = [#tpu.dimension_semantics<parallel>, #tpu.dimension_semantics<parallel>], iteration_bounds = array<i64: 2, 1>, scalar_prefetch = 0 : i64, scratch_operands = 0 : i64, tpu.core_type = #tpu.core_type<tc>, window_params = [{transform_indices = @transform_0, window_bounds = array<i64: 1, 8, 128>}, {transform_indices = @transform_1, window_bounds = array<i64: 1, 8, 128>}, {pipeline_mode = #tpu.pipeline_mode<synchronous>, transform_indices = @transform_2, window_bounds = array<i64: 2, 8, 8>}, {pipeline_mode = #tpu.pipeline_mode<synchronous>, transform_indices = @transform_3, window_bounds = array<i64: 8, 1>}, {transform_indices = @transform_4, window_bounds = array<i64: 1, 8, 128>}]} {
    %c0 = arith.constant 0 : index
    %c0_0 = arith.constant 0 : index
    %c0_1 = arith.constant 0 : index
    %0 = vector.load %arg2[%c0, %c0_0, %c0_1] : memref<1x8x128xf32, #tpu.memory_space<vmem>>, vector<1x8x128xf32>
    %1 = vector.shape_cast %0 : vector<1x8x128xf32> to vector<8x128xf32>
    %c0_2 = arith.constant 0 : index
    %c0_3 = arith.constant 0 : index
    %c0_4 = arith.constant 0 : index
    %2 = vector.load %arg4[%c0_2, %c0_3, %c0_4] : memref<2x8x8xf32, #tpu.memory_space<vmem>>, vector<1x8x8xf32>
    %3 = vector.shape_cast %2 : vector<1x8x8xf32> to vector<8x8xf32>
    %cst = arith.constant dense<0.000000e+00> : vector<8x128xf32>
    %4 = tpu.matmul %3, %1, %cst {dimension_numbers = #tpu.dot_dimension_numbers<[1], [0], [0], [1], [0, 0, 1, 1], [], []>} : vector<8x8xf32>, vector<8x128xf32>, vector<8x128xf32> -> vector<8x128xf32>
    %c0_5 = arith.constant 0 : index
    %c0_6 = arith.constant 0 : index
    %c0_7 = arith.constant 0 : index
    %5 = vector.load %arg3[%c0_5, %c0_6, %c0_7] : memref<1x8x128xf32, #tpu.memory_space<vmem>>, vector<1x8x128xf32>
    %6 = vector.shape_cast %5 : vector<1x8x128xf32> to vector<8x128xf32>
    %7 = tpu.concatenate %1, %6 in 1 : vector<8x128xf32>, vector<8x128xf32> -> vector<8x256xf32>
    %c1 = arith.constant 1 : index
    %c0_8 = arith.constant 0 : index
    %c0_9 = arith.constant 0 : index
    %8 = vector.load %arg4[%c1, %c0_8, %c0_9] : memref<2x8x8xf32, #tpu.memory_space<vmem>>, vector<1x8x8xf32>
    %9 = vector.shape_cast %8 : vector<1x8x8xf32> to vector<8x8xf32>
    %10 = vector.extract_strided_slice %7 {offsets = [0, 1], sizes = [8, 128], strides = [1, 1]} : vector<8x256xf32> to vector<8x128xf32>
    %cst_10 = arith.constant dense<0.000000e+00> : vector<8x128xf32>
    %11 = tpu.matmul %9, %10, %cst_10 {dimension_numbers = #tpu.dot_dimension_numbers<[1], [0], [0], [1], [0, 0, 1, 1], [], []>} : vector<8x8xf32>, vector<8x128xf32>, vector<8x128xf32> -> vector<8x128xf32>
    %12 = arith.addf %4, %11 : vector<8x128xf32>
    %c0_11 = arith.constant 0 : index
    %c0_12 = arith.constant 0 : index
    %13 = vector.load %arg5[%c0_11, %c0_12] : memref<8x1xf32, #tpu.memory_space<vmem>>, vector<8x1xf32>
    %14 = vector.broadcast %13 : vector<8x1xf32> to vector<8x128xf32>
    %15 = arith.addf %12, %14 : vector<8x128xf32>
    %c0_13 = arith.constant 0 : index
    %c0_14 = arith.constant 0 : index
    %c0_15 = arith.constant 0 : index
    %16 = vector.load %arg6[%c0_13, %c0_14, %c0_15] : memref<1x8x128xf32, #tpu.memory_space<vmem>>, vector<1x8x128xf32>
    %17 = vector.shape_cast %16 : vector<1x8x128xf32> to vector<8x128xf32>
    %18 = vector.shape_cast %15 : vector<8x128xf32> to vector<1x8x128xf32>
    tpu.vector_store %arg6[%c0_13, %c0_14, %c0_15], %18 {strides = array<i32>} : memref<1x8x128xf32, #tpu.memory_space<vmem>>, vector<1x8x128xf32>,
    return
  }
  func.func @transform_0(%arg0: i32, %arg1: i32) -> (i32, i32, i32) {
    %c0_i32 = arith.constant 0 : i32
    %c0_i32_0 = arith.constant 0 : i32
    return %arg0, %c0_i32, %arg1 : i32, i32, i32
  }
  func.func @transform_1(%arg0: i32, %arg1: i32) -> (i32, i32, i32) {
    %c1_i32 = arith.constant 1 : i32
    %0 = arith.addi %arg1, %c1_i32 : i32
    %c1_i32_0 = arith.constant 1 : i32
    %1 = arith.muli %0, %c1_i32_0 : i32
    %c0_i32 = arith.constant 0 : i32
    %c0_i32_1 = arith.constant 0 : i32
    return %arg0, %c0_i32, %1 : i32, i32, i32
  }
  func.func @transform_2(%arg0: i32, %arg1: i32) -> (i32, i32, i32) {
    %c0_i32 = arith.constant 0 : i32
    %c0_i32_0 = arith.constant 0 : i32
    %c0_i32_1 = arith.constant 0 : i32
    %c0_i32_2 = arith.constant 0 : i32
    return %c0_i32, %c0_i32_0, %c0_i32_1 : i32, i32, i32
  }
  func.func @transform_3(%arg0: i32, %arg1: i32) -> (i32, i32) {
    %c0_i32 = arith.constant 0 : i32
    %c0_i32_0 = arith.constant 0 : i32
    %c0_i32_1 = arith.constant 0 : i32
    return %c0_i32, %c0_i32_0 : i32, i32
  }
  func.func @transform_4(%arg0: i32, %arg1: i32) -> (i32, i32, i32) {
    %c0_i32 = arith.constant 0 : i32
    %c0_i32_0 = arith.constant 0 : i32
    return %arg0, %c0_i32, %arg1 : i32, i32, i32
  }
}

</mosaic_0001>

<bundles_post_ra>
// kernel: tpu_custom_call.1
= control target key start
LH: loop header
LB: loop body
LE: loop exit
PB: predicated region body
PF: predicated region fallthrough
CT: control target
= control target key end

     0   :  { %s982_s0 = inlined_call_operand.hbm [shape: f32[2,8,256], index: 0, kind: input, shape index: {}]   ;;  %s983_s1 = inlined_call_operand.hbm [shape: f32[2,8,256], index: 1, kind: input, shape index: {}]   ;;  %s984_s2 = inlined_call_operand.hbm [shape: f32[2,8,8], index: 2, kind: input, shape index: {}]   ;;  %s985_s3 = inlined_call_operand.vmem [shape: f32[8,1], index: 3, kind: input, shape index: {}]   ;;  %s986_s4 = inlined_call_operand.hbm [shape: f32[2,8,8], index: 4, kind: output, shape index: {}]  }
   0x1   :  { %991 = sst [smem:[#allocation18_spill]] %s984_s2 }
   0x2   :  { %9 = vsyncpa [#allocation3], 0 }
   0x3   :  { %11 = vsyncpa [#allocation3 + $0x1], 0 }
   0x4   :  { %12 = vsyncpa [#allocation6], 0 }
   0x5   :  { %14 = vsyncpa [#allocation6 + $0x1], 0 }
   0x6   :  { %15 = vsyncpa [#allocation4], 0 }
   0x7   :  { %17 = vsyncpa [#allocation4 + $0x1], 0  ;;  %s822_s15 = smov 0   ;;  %s824_s16 = smov 0  }
   0x8   :  { %s826_s17 = smov 0   ;;  %s828_s18 = smov 0  }
   0x9   :  { %s830_s19 = smov 0   ;;  %s832_s20 = smov 0  }
   0xa LB: > { %992 = sst [smem:[#allocation13_spill]] %s778_s17  ;;  %s853_s21 = sadd.s32 4294967295, %s790_s20   ;;  %s790_s20 = sphi %s832_s20, %s23_s20   ;;  %s786_s19 = sphi %s830_s19, %s1011_s19   ;;  %s782_s18 = sphi %s828_s18, %s1006_s18   ;;  %s778_s17 = sphi %s826_s17, %s1010_s17   ;;  %s774_s16 = sphi %s824_s16, %s1009_s16   ;;  %s770_s15 = sphi %s822_s15, %s1008_s15  }
   0xb   : > { %993 = sst [smem:[#allocation14_spill]] %s786_s19  ;;  %p500_p0 = scmp.ge.s32.totalorder %s790_s20, 1 }
   0xc   : > { %p58_p1 = scmp.eq.s32.totalorder %s853_s21, 0  ;;  %p168_p2 = scmp.lt.s32.totalorder %s790_s20, 3 }
   0xd   : > { %s994_s2 = sld [smem:[#allocation18_spill]]  ;;  %s792_s26 = smov [#allocation7]  }
   0xe   : > { %p861_p3 = pnand %p500_p0, %p168_p2  ;;  %s181_s27 = sshll.u32 %s792_s26, 4  ;;  %s182_s27 = int_to_ptr.vmem [resolvable:$true] %s181_s27 }
   0xf   : > { %p502_p6 = scmp.ge.s32.totalorder %s790_s20, 2  ;;  %s793_s28 = smov 128  }
  0x10   : > { %p532_p4 = pneg %p861_p3  ;;  %s794_s29 = smov 8  }
  0x11   : > { %s499_s30 = sadd.s32 4294967294, %s790_s20   ;;  %s35_s5 = sadd.s32 1, %s786_s19 }
  0x12   : > { %p533_p5 = pnand %p532_p4, %p58_p1  ;;  %s44_s6 = sadd.s32 1, %s778_s17 }
  0x13   : > { %s179_s24 = sshll.u32 %s994_s2, 4  ;;  %p37_p7 = scmp.ge.s32.totalorder %s35_s5, 2  ;;  %s180_s24 = int_to_ptr.hbm [resolvable:$true] %s179_s24 }
  0x14   : > { %535 = dma.hbm_to_vmem [thread:$0]  (!%p533_p5), %s180_s24, 256, %s182_s27, [#allocation6], %s793_s28, %s793_s28, %s794_s29  }
  0x15   : > { %p51_p8 = scmp.ne.s32.totalorder %s778_s17, %s774_s16  ;;  %p52_p9 = scmp.eq.s32.totalorder %s790_s20, 0 }
  0x16   : > { %p57_p10 = scmp.ne.s32.totalorder %s774_s16, %s770_s15  ;;  %s1013_s5 = smov (%p37_p7, %s35_s5), 0 }
  0x17   : > { %996 = sst [smem:[#allocation15_spill]] %s1013_s5  ;;  %p880_p11 = por %p52_p9, %p51_p8 }
  0x18   : > { %p886_p12 = por %p58_p1, %p57_p10  ;;  %s39_s9 = ssub.s32 %s786_s19, %s1013_s5 }
  0x19   : > { %p155_p13 = scmp.eq.s32.totalorder %s853_s21, 1  ;;  %p42_p0 = scmp.eq.s32.totalorder %s39_s9, 0 }
  0x1a   : > { %p161_p2 = scmp.eq.s32.totalorder %s499_s30, 1  ;;  %p548_p5 = scmp.lt.s32.totalorder %s790_s20, 2 }
  0x1b   : > { %p893_p4 = por %p155_p13, %p51_p8  ;;  %s198_s13 = sand.u32 1, %s778_s17  }
  0x1c   : > { %s899_s11 = scalar_select %p42_p0, %s778_s17, %s44_s6  }
  0x1d   : > { %p901_p7 = por %p161_p2, %p57_p10  ;;  %s503_s14 = sshll.u32 %s198_s13, 3 }
  0x1e   : > { %1000 = sst [smem:[#allocation16_spill]] %s899_s11  ;;  %s520_s22 = sshll.u32 %s786_s19, 4 }
  0x1f   : > { %s1001_s12 = scalar_select %p901_p7, 1, 0 }
  0x20   : > { %s208_s26 = scalar_lea.hbm %s982_s0, %s520_s22  ;;  %s202_s27 = scalar_lea.vmem [#allocation2], %s503_s14 }
  0x21   : > { %1002 = sst [smem:[#allocation17_spill]] %s1001_s12  ;;  %s212_s28 = sshll.u32 %s202_s27, 4  ;;  %s213_s28 = int_to_ptr.vmem [resolvable:$true] %s212_s28 }
  0x22   : > { %s210_s29 = sshll.u32 %s208_s26, 4  ;;  %p537_p8 = pnand %p548_p5, %p880_p11  ;;  %s211_s29 = int_to_ptr.hbm [resolvable:$true] %s210_s29 }
  0x23   : > { %s422_s9 = scalar_lea.hbm %s983_s1, %s520_s22  ;;  %s219_s2 = sand.u32 1, %s790_s20  }
  0x24   : > { %s199_s5 = scalar_lea.sflag [#allocation3], %s198_s13  ;;  %s423_s11 = scalar_lea.hbm %s422_s9, 8 }
  0x25   : > { %539 = dma.hbm_to_vmem [thread:$0]  (!%p537_p8), %s211_s29, 128, %s213_s28, %s199_s5  }
  0x26   : > { %s232_s19 = sshll.u32 %s423_s11, 4  ;;  %s223_s17 = scalar_lea.vmem [#allocation5], %s503_s14  ;;  %s233_s19 = int_to_ptr.hbm [resolvable:$true] %s232_s19 }
  0x27   : > { %s234_s12 = sshll.u32 %s223_s17, 4  ;;  %s220_s23 = scalar_lea.sflag [#allocation6], %s219_s2  ;;  %s235_s12 = int_to_ptr.vmem [resolvable:$true] %s234_s12 }
  0x28   : > { %542 = dma.hbm_to_vmem [thread:$0]  (!%p537_p8), %s233_s19, 128, %s235_s12, %s220_s23  }
  0x29   : > { %243 = sbr.rel (%p861_p3) target bundleno = 307 (0x133), region = 36  ;;  %s919_s7 = sand.u32 (!%p861_p3), 1, %s774_s16  }
  0x2a   : > { %s922_s22 = sshll.u32 (!%p861_p3), %s919_s7, 3  ;;  %s246_s5 = scalar_lea.sflag (!%p861_p3), [#allocation3], %s919_s7 }
  0x2b   : > { %s249_s11 = scalar_lea.vmem (!%p861_p3), [#allocation2], %s922_s22 }
  0x2e   : > { %753 = dma.done.wait (%p886_p12), %s246_s5, 128  }
  0x2f   : > { %755 = vsyncadd (%p886_p12), %s246_s5, 4294967168  ;;  %s255_s2 = sand.u32 1, %s853_s21   ;;  %s259_s19 = scalar_lea.vmem [#allocation5], %s922_s22 }
  0x30   : > { %s256_s17 = scalar_lea.sflag [#allocation6], %s255_s2 }
  0x31   : > { %757 = dma.done.wait (%p886_p12), %s256_s17, 128  }
  0x32   : > { %759 = vsyncadd (%p886_p12), %s256_s17, 4294967168 }
  0x33   : > { %761 = dma.done.wait (%p58_p1), [#allocation6], 256  }
  0x34   : > { %763 = vsyncadd (%p58_p1), [#allocation6], 4294967040  ;;  %v296_v0 = vld [vmem:[%s249_s11] sm:$0xff]  ;;  %v298_v1 = vld [vmem:[%s259_s19] sm:$0xff]  ;;  %s795_s25 = smov 127   ;;  %vm310_vm0 = vcmask 64512  }
  0x35   : > { %v604_v2 = vpack.i.bf16 %v298_v1, %v296_v0  ;;  %352 = vmatpush.msra.mxu1 %v296_v0  ;;  %v297_v3 = vld [vmem:[#allocation7] sm:$0xff]  ;;  %v796_v5 = vmov 0   ;;  %vm307_vm1 = vcmask 1039360   ;;  %v300_v9 = vld [vmem:[#allocation7 + $0x8] sm:$0xff]  ;;  %s517_s21 = sshll.u32 %s782_s18, 3  ;;  %s294_s26 = scalar_lea.vmem [#allocation8], %s922_s22 }
  0x36   : > { %515 = vmatmul.msk.f32.vlgmr.msra.gmra.mxu1 %vm310_vm0, %v297_v3  ;;  %v357_v4 = vld [vmem:[%s985_s3] sm:$0xff]  ;;  %609 = vset.pattern.permute.xlu0 %v796_v5  ;;  %s377_s24 = scalar_lea.hbm %s986_s4, %s517_s21  ;;  %s379_s27 = sshll.u32 %s294_s26, 4  ;;  %s380_s27 = int_to_ptr.vmem [resolvable:$true] %s379_s27 }
  0x37   : > { %605 = vrot.lane.b32.xlu0 %v604_v2, %s795_s25  ;;  %s381_s28 = sshll.u32 %s377_s24, 4  ;;  %s366_s29 = scalar_lea.sflag [#allocation4], %s919_s7  ;;  %s382_s28 = int_to_ptr.hbm [resolvable:$true] %s381_s28 }
  0x38   : > { %s714_s30 = sshra.s32 %s382_s28, 4  ;;  %s720_s23 = scalar_lea.hbm %s986_s4, 16  ;;  %s715_s30 = int_to_ptr.hbm [resolvable:$true] %s714_s30 }
  0x39   : > { %s716_s18 = scalar_lea.hbm %s715_s30, 8  ;;  %p721_p10 = scmp.lt.s32.totalorder %s715_s30, %s986_s4 }
  0x3a   : > { %p717_p1 = scmp.ne.s32.totalorder %s715_s30, %s716_s18  ;;  %p722_p11 = scmp.lt.s32.totalorder %s720_s23, %s716_s18 }
  0x3c   : > { %p718_p3 = pnand %p717_p1, %p893_p4  ;;  %p723_p12 = por %p722_p11, %p721_p10 }
  0x3e   : > { %p719_p9 = pneg %p718_p3 }
  0x3f   : > { %360 = vperm.xlu0 %609, %v357_v4  }
  0x40   : > { %p724_p13 = pnand %p723_p12, %p719_p9 }
  0xa9   : > { %v606_v6 = vpop.permute.xlu0 %605 }
  0xaa   : > { %v608_v7 = vunpack.i.h.bf16 %v606_v6  ;;  %v607_v8 = vunpack.i.l.bf16 %v606_v6 }
  0xac   : > { %v308_v10 = vsel %vm307_vm1, %v607_v8, %v608_v7 }
  0xad   : > { %329 = vmatpush.msra.mxu0 %v308_v10 }
  0xae   : > { %514 = vmatmul.msk.f32.vlgmr.msra.gmra.mxu0 %vm310_vm0, %v300_v9 }
  0xb1   : > { %v361_v13 = vpop.permute.xlu0 %360 }
  0xb3   : > { %v354_v11 = vpop.f32.mrf.mxu1 }
 0x12b   : > { %v331_v12 = vpop.f32.mrf.mxu0 }
 0x12c   : > { %v355_v14 = vadd.f32 %v354_v11, %v331_v12 }
 0x12e   : > { %v363_v15 = vadd.f32 %v361_v13, %v355_v14 }
 0x130   : > { %364 = vst [vmem:[%s294_s26] sm:$0xff] %v363_v15 }
 0x131   : > { %727 = shalt.err (!%p724_p13)
}
 0x132   : > { %530 = dma.vmem_to_hbm [thread:$0]  (%p893_p4), %s380_s27, 128, %s382_s28, %s366_s29  }
 0x133 PF: > { %s393_s11 = sand.u32 1, %s770_s15   ;;  %p544_p0 = pnand %p502_p6, %p901_p7 }
 0x134   : > { %s394_s2 = scalar_lea.sflag [#allocation4], %s393_s11 }
 0x135   : > { %p545_p2 = pneg %p544_p0 }
 0x137   : > { %765 = dma.done.wait (%p545_p2), %s394_s2, 128  }
 0x138   : > { %767 = vsyncadd (%p545_p2), %s394_s2, 4294967168  ;;  %s23_s20 = sadd.s32 1, %s790_s20   ;;  %s1004_s17 = sld [smem:[#allocation13_spill]] }
 0x139   : > { %p20_p5 = scmp.ge.s32.totalorder %s23_s20, 4   ;;  %s1005_s19 = sld [smem:[#allocation16_spill]] }
 0x13a   : > { %s1006_s18 = sld [smem:[#allocation14_spill]]  ;;  %s1008_s15 = smov %s774_s16 }
 0x13b   : > { %s1007_s10 = sld [smem:[#allocation15_spill]] }
 0x13d   :  { %22 = sbr.rel (!%p20_p5) target bundleno = 10 (0xa), region = 99 }
 0x13e   : > { %s1009_s16 = smov %s1004_s17 }
 0x13f   : > { %s1010_s17 = smov %s1005_s19 }
 0x141   : > { %s1011_s19 = smov %s1007_s10 }
 0x142   :  { %400 = vsyncpa [#allocation3], 1 }
 0x143   :  { %402 = vsyncpa [#allocation3 + $0x1], 1 }
 0x144   :  { %403 = vsyncpa [#allocation6], 1 }
 0x145   :  { %405 = vsyncpa [#allocation6 + $0x1], 1 }
 0x146   :  { %406 = vsyncpa [#allocation4], 1 }
 0x147   :  { %408 = vsyncpa [#allocation4 + $0x1], 1 }

</bundles_post_ra>
